<compile_context>
chip_gen: v7x
topology: tpu7x:2x2x1
jax: 0.10.0
libtpu: 0.0.40
codegen_flags: <defaults>
</compile_context>

<pallas_src>
import functools

import jax
import jax.numpy as jnp
from jax.experimental import pallas as pl
from jax.experimental.pallas import tpu as pltpu


def _hswish_kernel(x_ref, o_ref):
    x = x_ref[...]
    # relu6(x + 3) = clamp(x + 3, 0, 6); weak promotion keeps native dtype.
    r6 = jnp.clip(x + 3.0, 0.0, 6.0)
    o_ref[...] = (x * r6 * (1.0 / 6.0)).astype(o_ref.dtype)


def _round_up(a: int, m: int) -> int:
    return ((a + m - 1) // m) * m


def _device_tuning():
    """(target_block_bytes, vmem_limit_bytes) chosen per TPU generation."""
    try:
        kind = jax.devices()[0].device_kind.lower()
    except Exception:
        kind = ""
    if "v5 lite" in kind or "v5e" in kind or "v5litepod" in kind:
        # v5e: slow HBM makes per-step overhead <10% already; keep 2 MiB
        # blocks, bump the 16 MiB default scoped limit for headroom.
        return 2 << 20, 32 << 20
    if "v7" in kind:
        # v7x: 3.2 TB/s HBM but only 64 MiB physical VMEM per TensorCore.
        return 4 << 20, 48 << 20
    if "v6" in kind or "v5p" in kind or "v4" in kind:
        # Large-VMEM parts (128 MiB physical): go wide.
        return 8 << 20, 64 << 20
    # Unknown / older hardware: conservative defaults.
    return 2 << 20, None


def _hswish_2d(x2d, tr, cols, vmem_limit_bytes):
    rows = x2d.shape[0]
    grid = (pl.cdiv(rows, tr),)
    return pl.pallas_call(
        _hswish_kernel,
        out_shape=jax.ShapeDtypeStruct(x2d.shape, x2d.dtype),
        grid_spec=pltpu.PrefetchScalarGridSpec(
            num_scalar_prefetch=0,
            grid=grid,
            in_specs=[pl.BlockSpec((tr, cols), lambda i: (i, 0))],
            out_specs=pl.BlockSpec((tr, cols), lambda i: (i, 0)),
        ),
        compiler_params=pltpu.CompilerParams(
            dimension_semantics=("parallel",),
            vmem_limit_bytes=vmem_limit_bytes,
        ),
    )(x2d)


def _hswish_flat_aligned(flat, cols, sublane, itemsize,
                         target_block_bytes, vmem_limit_bytes):
    """Hswish over a flat array whose length is an exact multiple of cols."""
    n = flat.shape[0]
    rows = n // cols

    # Row tile: ~target_block_bytes per block, multiple of the native sublane.
    tr = max(1, target_block_bytes // (itemsize * cols))
    tr = max(sublane, (tr // sublane) * sublane)

    total_bytes = n * itemsize
    if rows <= tr:
        if total_bytes > (2 << 20) and rows >= 2 * sublane:
            # Force >= 2 grid steps so the 'parallel' axis can be sharded
            # across both v7x TensorCores (negligible cost on v5e/v6e).
            tr = _round_up(pl.cdiv(rows, 2), sublane)
        else:
            # Small input: single whole-array block (exempt from the (8,128)
            # block-shape divisibility constraint).
            tr = rows

    g = pl.cdiv(rows, tr)
    if g > 1:
        # Balance block sizes across steps; this often makes tr divide rows
        # exactly, avoiding a masked partial store on the final block.
        tr = max(sublane, min(tr, _round_up(pl.cdiv(rows, g), sublane)))

    x2d = flat.reshape(rows, cols)
    out2d = _hswish_2d(x2d, tr, cols, vmem_limit_bytes)
    return out2d.reshape(-1)


def _hswish_impl(x, target_block_bytes, vmem_limit_bytes):
    orig_shape = x.shape
    dtype = x.dtype
    n = x.size
    if n == 0:
        return x

    itemsize = jnp.dtype(dtype).itemsize
    sublane = max(8, 32 // itemsize)          # native sublane tile: 8 / 16 / 32

    flat = x.reshape(-1)

    # Lane width: widest of {1024, 512, 256, 128} dividing n -> no padding.
    # Prefer one that also makes rows a multiple of the native sublane tile.
    divisors = [c for c in (1024, 512, 256, 128) if n % c == 0]
    cols = 0
    for c in divisors:
        if (n // c) % sublane == 0:
            cols = c
            break
    if cols == 0 and divisors:
        cols = divisors[0]

    if cols == 0:
        # n is not a multiple of 128 (rare). Run the kernel on the aligned
        # prefix and compute the tiny tail (< cols*sublane elems) in plain
        # jnp — no whole-tensor pad/concat/slice round trips through HBM.
        cols = 128
        granule = cols * sublane
        n_main = (n // granule) * granule
        tail = flat[n_main:]
        tail_out = (tail * jnp.clip(tail + 3.0, 0.0, 6.0) * (1.0 / 6.0)).astype(dtype)
        if n_main == 0:
            return tail_out.reshape(orig_shape)
        main_out = _hswish_flat_aligned(flat[:n_main], cols, sublane, itemsize,
                                        target_block_bytes, vmem_limit_bytes)
        return jnp.concatenate([main_out, tail_out]).reshape(orig_shape)

    out = _hswish_flat_aligned(flat, cols, sublane, itemsize,
                               target_block_bytes, vmem_limit_bytes)
    return out.reshape(orig_shape)


@functools.partial(jax.jit,
                   static_argnames=("target_block_bytes", "vmem_limit_bytes"))
def _hswish_jit(x, *, target_block_bytes, vmem_limit_bytes):
    return _hswish_impl(x, target_block_bytes, vmem_limit_bytes)


def hswish(x: jax.Array) -> jax.Array:
    """Elementwise hard-swish matching torch: x * relu6(x + 3) / 6."""
    # TODO(synk): if callers can donate x, expose input_output_aliases={0: 0}
    # (outside donation it would just force a defensive copy, so it's off).
    tbb, vlim = _device_tuning()
    return _hswish_jit(x, target_block_bytes=tbb, vmem_limit_bytes=vlim)


def _hswish_ref(x):
    return x * jnp.clip(x + 3.0, 0.0, 6.0) * (1.0 / 6.0)


if __name__ == "__main__":
    k_small, k_big, k_odd = jax.random.split(jax.random.PRNGKey(0), 3)

    # Small NCHW activation (spec-sized test input): single-block path.
    x_small = jax.random.normal(k_small, (2, 4, 16, 16), dtype=jnp.float32) * 4.0
    y_small = hswish(x_small)
    jax.block_until_ready(y_small)
    assert y_small.shape == x_small.shape and y_small.dtype == x_small.dtype
    assert jnp.allclose(y_small, _hswish_ref(x_small), atol=1e-6, rtol=1e-6), \
        "small-input mismatch vs reference"

    # Larger activation: multi-block tiled path (>= 2 grid steps).
    x_big = jax.random.normal(k_big, (8, 32, 56, 56), dtype=jnp.float32) * 4.0
    y_big = hswish(x_big)
    jax.block_until_ready(y_big)
    assert jnp.allclose(y_big, _hswish_ref(x_big), atol=1e-6, rtol=1e-6), \
        "large-input mismatch vs reference"

    # Non-128-multiple element count: aligned prefix kernel + jnp tail path.
    x_odd = jax.random.normal(k_odd, (3, 5, 7, 11), dtype=jnp.float32) * 4.0
    y_odd = hswish(x_odd)
    jax.block_until_ready(y_odd)
    assert jnp.allclose(y_odd, _hswish_ref(x_odd), atol=1e-6, rtol=1e-6), \
        "odd-shape mismatch vs reference"

    print("KERNEL_OK")
</pallas_src>

<mosaic_0001>
module attributes {stable_mosaic.version = 11 : i64} {
  func.func @_hswish_kernel(%arg0: i32, %arg1: memref<8x256xf32, #tpu.memory_space<vmem>>, %arg2: memref<8x256xf32, #tpu.memory_space<vmem>>) attributes {dimension_semantics = [#tpu.dimension_semantics<parallel>], iteration_bounds = array<i64: 1>, scalar_prefetch = 0 : i64, scratch_operands = 0 : i64, tpu.core_type = #tpu.core_type<tc>, window_params = [{transform_indices = @transform_0, window_bounds = array<i64: 8, 256>}, {transform_indices = @transform_1, window_bounds = array<i64: 8, 256>}]} {
    %c0 = arith.constant 0 : index
    %c0_0 = arith.constant 0 : index
    %0 = vector.load %arg1[%c0, %c0_0] : memref<8x256xf32, #tpu.memory_space<vmem>>, vector<8x256xf32>
    %cst = arith.constant 3.000000e+00 : f32
    %1 = vector.broadcast %cst : f32 to vector<8x256xf32>
    %2 = arith.addf %0, %1 : vector<8x256xf32>
    %cst_1 = arith.constant 0.000000e+00 : f32
    %cst_2 = arith.constant 6.000000e+00 : f32
    %3 = vector.broadcast %cst_1 : f32 to vector<8x256xf32>
    %4 = arith.maximumf %3, %2 : vector<8x256xf32>
    %5 = vector.broadcast %cst_2 : f32 to vector<8x256xf32>
    %6 = arith.minimumf %5, %4 : vector<8x256xf32>
    %7 = arith.mulf %0, %6 : vector<8x256xf32>
    %cst_3 = arith.constant 0.166666672 : f32
    %8 = vector.broadcast %cst_3 : f32 to vector<8x256xf32>
    %9 = arith.mulf %7, %8 : vector<8x256xf32>
    %c0_4 = arith.constant 0 : index
    %c0_5 = arith.constant 0 : index
    %10 = vector.load %arg2[%c0_4, %c0_5] : memref<8x256xf32, #tpu.memory_space<vmem>>, vector<8x256xf32>
    tpu.vector_store %arg2[%c0_4, %c0_5], %9 {strides = array<i32>} : memref<8x256xf32, #tpu.memory_space<vmem>>, vector<8x256xf32>,
    return
  }
  func.func @transform_0(%arg0: i32) -> (i32, i32) {
    %c0_i32 = arith.constant 0 : i32
    %c0_i32_0 = arith.constant 0 : i32
    return %arg0, %c0_i32 : i32, i32
  }
  func.func @transform_1(%arg0: i32) -> (i32, i32) {
    %c0_i32 = arith.constant 0 : i32
    %c0_i32_0 = arith.constant 0 : i32
    return %arg0, %c0_i32 : i32, i32
  }
}

</mosaic_0001>

<bundles_post_ra>
// kernel: _hswish_jit.1
= control target key start
LH: loop header
LB: loop body
LE: loop exit
PB: predicated region body
PF: predicated region fallthrough
CT: control target
= control target key end

     0   :  { %s48_s0 = inlined_call_operand.vmem [shape: f32[8,256], index: 0, kind: input, shape index: {}]   ;;  %s49_s1 = inlined_call_operand.vmem [shape: f32[8,256], index: 1, kind: output, shape index: {}]  }
   0x1   :  { %v8_v0 = vld [vmem:[%s48_s0] sm:$0xff]  ;;  %v9_v1 = vld [vmem:[%s48_s0 + $0x8] sm:$0xff] }
   0x2   :  { %v10_v2 = vadd.f32 3.0, %v8_v0  ;;  %v11_v3 = vadd.f32 3.0, %v9_v1 }
   0x4   :  { %v12_v4 = vmax.f32 %v10_v2, 0.0  ;;  %v13_v5 = vmax.f32 %v11_v3, 0.0 }
   0x6   :  { %v14_v6 = vmin.f32 %v12_v4, 6.0  ;;  %v15_v7 = vmin.f32 %v13_v5, 6.0 }
   0x8   :  { %v16_v8 = vmul.f32 %v14_v6, %v8_v0  ;;  %v17_v9 = vmul.f32 %v15_v7, %v9_v1 }
   0xa   :  { %v18_v10 = vmul.f32 0.16666667, %v16_v8  ;;  %v19_v11 = vmul.f32 0.16666667, %v17_v9 }
   0xc   :  { %20 = vst [vmem:[%s49_s1] sm:$0xff] %v18_v10  ;;  %21 = vst [vmem:[%s49_s1 + $0x8] sm:$0xff] %v19_v11 }

</bundles_post_ra>
